<compile_context>
chip_gen: v7x
topology: tpu7x:2x2x1
jax: 0.10.0
libtpu: 0.0.40
codegen_flags: <defaults>
</compile_context>

<pallas_src>
import jax
import jax.numpy as jnp
from jax.experimental import pallas as pl
from jax.experimental.pallas import tpu as pltpu


def _make_kernel(fuse_gate_k):
    """Build the fusion kernel body.

    fuse_gate_k=True : one K=2D gate matmul on an in-kernel lane-axis concat
                       (D lane-aligned, so the concat is vreg placement only).
    fuse_gate_k=False: concat split algebraically into two K=D dots.
    """
    if fuse_gate_k:
        def kernel(img_ref, lmk_ref, wg_ref, bg_ref, wf_ref, bf_ref, out_ref):
            w_dt = wg_ref.dtype
            img = img_ref[...].astype(w_dt)
            lmk = lmk_ref[...].astype(w_dt)
            xg = jnp.concatenate([img, lmk], axis=-1)          # (tb, 2D), lane-aligned
            z = (jnp.dot(xg, wg_ref[...], preferred_element_type=jnp.float32)
                 + bg_ref[...].astype(jnp.float32))
            gate = jax.nn.sigmoid(z)                           # EUP, f32
            img_f = img_ref[...].astype(jnp.float32)
            lmk_f = lmk_ref[...].astype(jnp.float32)
            fused = lmk_f + gate * (img_f - lmk_f)             # == gate*img + (1-gate)*lmk
            out = (jnp.dot(fused.astype(wf_ref.dtype), wf_ref[...],
                           preferred_element_type=jnp.float32)
                   + bf_ref[...].astype(jnp.float32))
            out_ref[...] = out.astype(out_ref.dtype)
    else:
        def kernel(img_ref, lmk_ref, wgi_ref, wgl_ref, bg_ref, wf_ref, bf_ref,
                   out_ref):
            w_dt = wgi_ref.dtype
            img = img_ref[...].astype(w_dt)
            lmk = lmk_ref[...].astype(w_dt)
            z = (jnp.dot(img, wgi_ref[...], preferred_element_type=jnp.float32)
                 + jnp.dot(lmk, wgl_ref[...], preferred_element_type=jnp.float32)
                 + bg_ref[...].astype(jnp.float32))
            gate = jax.nn.sigmoid(z)
            img_f = img_ref[...].astype(jnp.float32)
            lmk_f = lmk_ref[...].astype(jnp.float32)
            fused = lmk_f + gate * (img_f - lmk_f)
            out = (jnp.dot(fused.astype(wf_ref.dtype), wf_ref[...],
                           preferred_element_type=jnp.float32)
                   + bf_ref[...].astype(jnp.float32))
            out_ref[...] = out.astype(out_ref.dtype)
    return kernel


def prepare_params(params, *, dtype=None):
    """One-time conversion of torch-layout params to kernel layout.

    params (torch nn.Linear layout): w_gate (D, 2D), b_gate (D,),
                                     w_fusion (D, D), b_fusion (D,).
    Weights are transposed to (in, out); the gate weight is kept whole when D is
    lane-aligned (fused K=2D matmul) or split into img/lmk halves otherwise.
    Optionally cast to `dtype` (e.g. jnp.bfloat16: half the HBM traffic, 2-4x
    MXU rate; int8 would be a further v5e/v6e-only option when weight-DMA bound).
    """
    D = params["w_fusion"].shape[0]
    wg_t = params["w_gate"].T                       # (2D, D)
    fuse_gate_k = (D % 128 == 0)
    prepared = {
        "fuse_gate_k": fuse_gate_k,
        "bg": params["b_gate"].reshape(1, D),
        "wf": params["w_fusion"].T,                 # (D, D)
        "bf": params["b_fusion"].reshape(1, D),
    }
    if fuse_gate_k:
        prepared["wg"] = wg_t                       # (2D, D), single resident weight
    else:
        prepared["wg_i"] = wg_t[:D]                 # image half
        prepared["wg_l"] = wg_t[D:]                 # landmark half
    if dtype is not None:
        prepared = {k: (v.astype(dtype) if k != "fuse_gate_k" else v)
                    for k, v in prepared.items()}
    return prepared


def gated_fusion(image_feature, landmark_feature, prepared, *, tb=512):
    """image_feature, landmark_feature: (B, D). Returns (B, D)."""
    B, D = image_feature.shape

    # Batch tile: big (512-row tiles ~85% of the mem-bound roofline vs ~63% at
    # 256), multiple of 8, no larger than the batch rounded down to 8 so edge
    # masking is confined to a single partial block. No forced multi-step split
    # on single-TC v5e/v6e.
    tb = max(8, min(tb, (B // 8) * 8 if B >= 8 else 8))
    grid = (pl.cdiv(B, tb),)                        # ragged edge block is masked by Pallas

    x_bytes = jnp.dtype(image_feature.dtype).itemsize
    w_bytes = jnp.dtype(prepared["wf"].dtype).itemsize

    cost = pl.CostEstimate(
        flops=6 * B * D * D + 6 * B * D,
        transcendentals=B * D,                                  # sigmoid
        bytes_accessed=3 * B * D * x_bytes + (3 * D * D + 2 * D) * w_bytes)

    # Rough VMEM plan (double-buffered feature tiles + resident weights).
    est_vmem = (3 * 2 * tb * D * x_bytes
                + 2 * (3 * D * D + 2 * D) * w_bytes)
    vmem_limit = None
    if est_vmem > (12 << 20):            # headroom under the 16 MiB v5e scoped default
        vmem_limit = min(int(est_vmem * 1.5), 64 << 20)   # 64 MiB = v7x physical ceiling

    feat_spec = pl.BlockSpec((tb, D), lambda i: (i, 0))
    b_spec = pl.BlockSpec((1, D), lambda i: (0, 0))
    wf_spec = pl.BlockSpec((D, D), lambda i: (0, 0))            # weights stay resident

    if prepared["fuse_gate_k"]:
        kernel = _make_kernel(True)
        wg_spec = pl.BlockSpec((2 * D, D), lambda i: (0, 0))
        weight_specs = [wg_spec, b_spec, wf_spec, b_spec]
        weight_args = (prepared["wg"], prepared["bg"], prepared["wf"],
                       prepared["bf"])
    else:
        kernel = _make_kernel(False)
        weight_specs = [wf_spec, wf_spec, b_spec, wf_spec, b_spec]
        weight_args = (prepared["wg_i"], prepared["wg_l"], prepared["bg"],
                       prepared["wf"], prepared["bf"])

    out = pl.pallas_call(
        kernel,
        out_shape=jax.ShapeDtypeStruct((B, D), image_feature.dtype),
        grid_spec=pltpu.PrefetchScalarGridSpec(
            num_scalar_prefetch=0,
            grid=grid,
            in_specs=[feat_spec, feat_spec, *weight_specs],
            out_specs=feat_spec,
        ),
        compiler_params=pltpu.CompilerParams(
            dimension_semantics=("parallel",),
            vmem_limit_bytes=vmem_limit),
        cost_estimate=cost,
    )(image_feature, landmark_feature, *weight_args)
    return out


def init_params(key, feature_dim):
    k1, k2, k3, k4 = jax.random.split(key, 4)
    # torch nn.Linear layout: weights are (out, in)
    w_gate = jax.random.normal(k1, (feature_dim, feature_dim * 2), jnp.float32) * 0.05
    b_gate = jax.random.normal(k2, (feature_dim,), jnp.float32) * 0.05
    w_fusion = jax.random.normal(k3, (feature_dim, feature_dim), jnp.float32) * 0.05
    b_fusion = jax.random.normal(k4, (feature_dim,), jnp.float32) * 0.05
    return {"w_gate": w_gate, "b_gate": b_gate,
            "w_fusion": w_fusion, "b_fusion": b_fusion}


def reference(image_feature, landmark_feature, params):
    combined = jnp.concatenate([image_feature, landmark_feature], axis=-1)
    gate = jax.nn.sigmoid(combined @ params["w_gate"].T + params["b_gate"])
    fused = gate * image_feature + (1.0 - gate) * landmark_feature
    return fused @ params["w_fusion"].T + params["b_fusion"]


if __name__ == "__main__":
    # Ragged batch (not a tile multiple) exercises the masked edge block.
    B, D = 20, 128
    key = jax.random.PRNGKey(0)
    k_img, k_lmk, k_par = jax.random.split(key, 3)
    image_feature = jax.random.normal(k_img, (B, D), jnp.float32)
    landmark_feature = jax.random.normal(k_lmk, (B, D), jnp.float32)
    params = init_params(k_par, D)

    # f32 path: strict check against the reference.
    prepared_f32 = prepare_params(params)          # transpose done once, not per call
    out_f32 = jax.block_until_ready(
        gated_fusion(image_feature, landmark_feature, prepared_f32))
    ref_f32 = reference(image_feature, landmark_feature, params)
    assert out_f32.shape == ref_f32.shape, (out_f32.shape, ref_f32.shape)
    assert jnp.allclose(out_f32, ref_f32, atol=2e-4, rtol=2e-4), "f32 mismatch"

    # bf16 I/O path (half the activation+weight HBM bytes, faster MXU); compare
    # against a reference fed the same bf16-quantized operands, loose tolerance.
    prepared_bf16 = prepare_params(params, dtype=jnp.bfloat16)
    img_bf = image_feature.astype(jnp.bfloat16)
    lmk_bf = landmark_feature.astype(jnp.bfloat16)
    out_bf16 = jax.block_until_ready(gated_fusion(img_bf, lmk_bf, prepared_bf16))
    params_q = {k: v.astype(jnp.bfloat16).astype(jnp.float32)
                for k, v in params.items()}
    ref_bf16 = reference(img_bf.astype(jnp.float32), lmk_bf.astype(jnp.float32),
                         params_q)
    assert out_bf16.shape == ref_bf16.shape
    assert jnp.allclose(out_bf16.astype(jnp.float32), ref_bf16,
                        atol=5e-2, rtol=5e-2), "bf16 mismatch"

    print("KERNEL_OK")
</pallas_src>

<mosaic_0001>
module attributes {stable_mosaic.version = 11 : i64} {
  func.func @kernel(%arg0: i32, %arg1: memref<16x128xf32, #tpu.memory_space<vmem>>, %arg2: memref<16x128xf32, #tpu.memory_space<vmem>>, %arg3: memref<256x128xf32, #tpu.memory_space<vmem>>, %arg4: memref<1x128xf32, #tpu.memory_space<vmem>>, %arg5: memref<128x128xf32, #tpu.memory_space<vmem>>, %arg6: memref<1x128xf32, #tpu.memory_space<vmem>>, %arg7: memref<16x128xf32, #tpu.memory_space<vmem>>) attributes {dimension_semantics = [#tpu.dimension_semantics<parallel>], iteration_bounds = array<i64: 2>, scalar_prefetch = 0 : i64, scratch_operands = 0 : i64, tpu.core_type = #tpu.core_type<tc>, window_params = [{transform_indices = @transform_0, window_bounds = array<i64: 16, 128>}, {transform_indices = @transform_1, window_bounds = array<i64: 16, 128>}, {pipeline_mode = #tpu.pipeline_mode<synchronous>, transform_indices = @transform_2, window_bounds = array<i64: 256, 128>}, {pipeline_mode = #tpu.pipeline_mode<synchronous>, transform_indices = @transform_3, window_bounds = array<i64: 1, 128>}, {pipeline_mode = #tpu.pipeline_mode<synchronous>, transform_indices = @transform_4, window_bounds = array<i64: 128, 128>}, {pipeline_mode = #tpu.pipeline_mode<synchronous>, transform_indices = @transform_5, window_bounds = array<i64: 1, 128>}, {transform_indices = @transform_6, window_bounds = array<i64: 16, 128>}]} {
    %c0 = arith.constant 0 : index
    %c0_0 = arith.constant 0 : index
    %0 = vector.load %arg1[%c0, %c0_0] : memref<16x128xf32, #tpu.memory_space<vmem>>, vector<16x128xf32>
    %c0_1 = arith.constant 0 : index
    %c0_2 = arith.constant 0 : index
    %1 = vector.load %arg2[%c0_1, %c0_2] : memref<16x128xf32, #tpu.memory_space<vmem>>, vector<16x128xf32>
    %2 = tpu.concatenate %0, %1 in 1 : vector<16x128xf32>, vector<16x128xf32> -> vector<16x256xf32>
    %c0_3 = arith.constant 0 : index
    %c0_4 = arith.constant 0 : index
    %3 = vector.load %arg3[%c0_3, %c0_4] : memref<256x128xf32, #tpu.memory_space<vmem>>, vector<256x128xf32>
    %cst = arith.constant dense<0.000000e+00> : vector<16x128xf32>
    %4 = tpu.matmul %2, %3, %cst {dimension_numbers = #tpu.dot_dimension_numbers<[1], [0], [0], [1], [0, 0, 1, 1], [], []>} : vector<16x256xf32>, vector<256x128xf32>, vector<16x128xf32> -> vector<16x128xf32>
    %c0_5 = arith.constant 0 : index
    %c0_6 = arith.constant 0 : index
    %5 = vector.load %arg4[%c0_5, %c0_6] : memref<1x128xf32, #tpu.memory_space<vmem>>, vector<1x128xf32>
    %6 = vector.broadcast %5 : vector<1x128xf32> to vector<16x128xf32>
    %7 = arith.addf %4, %6 : vector<16x128xf32>
    %8 = arith.negf %7 : vector<16x128xf32>
    %9 = math.exp %8 : vector<16x128xf32>
    %cst_7 = arith.constant 1.000000e+00 : f32
    %10 = vector.broadcast %cst_7 : f32 to vector<16x128xf32>
    %11 = arith.addf %10, %9 : vector<16x128xf32>
    %12 = arith.divf %10, %11 : vector<16x128xf32>
    %c0_8 = arith.constant 0 : index
    %c0_9 = arith.constant 0 : index
    %13 = vector.load %arg1[%c0_8, %c0_9] : memref<16x128xf32, #tpu.memory_space<vmem>>, vector<16x128xf32>
    %c0_10 = arith.constant 0 : index
    %c0_11 = arith.constant 0 : index
    %14 = vector.load %arg2[%c0_10, %c0_11] : memref<16x128xf32, #tpu.memory_space<vmem>>, vector<16x128xf32>
    %15 = arith.subf %13, %14 : vector<16x128xf32>
    %16 = arith.mulf %12, %15 : vector<16x128xf32>
    %17 = arith.addf %14, %16 : vector<16x128xf32>
    %c0_12 = arith.constant 0 : index
    %c0_13 = arith.constant 0 : index
    %18 = vector.load %arg5[%c0_12, %c0_13] : memref<128x128xf32, #tpu.memory_space<vmem>>, vector<128x128xf32>
    %cst_14 = arith.constant dense<0.000000e+00> : vector<16x128xf32>
    %19 = tpu.matmul %17, %18, %cst_14 {dimension_numbers = #tpu.dot_dimension_numbers<[1], [0], [0], [1], [0, 0, 1, 1], [], []>} : vector<16x128xf32>, vector<128x128xf32>, vector<16x128xf32> -> vector<16x128xf32>
    %c0_15 = arith.constant 0 : index
    %c0_16 = arith.constant 0 : index
    %20 = vector.load %arg6[%c0_15, %c0_16] : memref<1x128xf32, #tpu.memory_space<vmem>>, vector<1x128xf32>
    %21 = vector.broadcast %20 : vector<1x128xf32> to vector<16x128xf32>
    %22 = arith.addf %19, %21 : vector<16x128xf32>
    %c0_17 = arith.constant 0 : index
    %c0_18 = arith.constant 0 : index
    %23 = vector.load %arg7[%c0_17, %c0_18] : memref<16x128xf32, #tpu.memory_space<vmem>>, vector<16x128xf32>
    tpu.vector_store %arg7[%c0_17, %c0_18], %22 {strides = array<i32>} : memref<16x128xf32, #tpu.memory_space<vmem>>, vector<16x128xf32>,
    return
  }
  func.func @transform_0(%arg0: i32) -> (i32, i32) {
    %c0_i32 = arith.constant 0 : i32
    %c0_i32_0 = arith.constant 0 : i32
    return %arg0, %c0_i32 : i32, i32
  }
  func.func @transform_1(%arg0: i32) -> (i32, i32) {
    %c0_i32 = arith.constant 0 : i32
    %c0_i32_0 = arith.constant 0 : i32
    return %arg0, %c0_i32 : i32, i32
  }
  func.func @transform_2(%arg0: i32) -> (i32, i32) {
    %c0_i32 = arith.constant 0 : i32
    %c0_i32_0 = arith.constant 0 : i32
    %c0_i32_1 = arith.constant 0 : i32
    return %c0_i32, %c0_i32_0 : i32, i32
  }
  func.func @transform_3(%arg0: i32) -> (i32, i32) {
    %c0_i32 = arith.constant 0 : i32
    %c0_i32_0 = arith.constant 0 : i32
    %c0_i32_1 = arith.constant 0 : i32
    return %c0_i32, %c0_i32_0 : i32, i32
  }
  func.func @transform_4(%arg0: i32) -> (i32, i32) {
    %c0_i32 = arith.constant 0 : i32
    %c0_i32_0 = arith.constant 0 : i32
    %c0_i32_1 = arith.constant 0 : i32
    return %c0_i32, %c0_i32_0 : i32, i32
  }
  func.func @transform_5(%arg0: i32) -> (i32, i32) {
    %c0_i32 = arith.constant 0 : i32
    %c0_i32_0 = arith.constant 0 : i32
    %c0_i32_1 = arith.constant 0 : i32
    return %c0_i32, %c0_i32_0 : i32, i32
  }
  func.func @transform_6(%arg0: i32) -> (i32, i32) {
    %c0_i32 = arith.constant 0 : i32
    %c0_i32_0 = arith.constant 0 : i32
    return %arg0, %c0_i32 : i32, i32
  }
}

</mosaic_0001>

<bundles_post_ra>
// kernel: tpu_custom_call.1
= control target key start
LH: loop header
LB: loop body
LE: loop exit
PB: predicated region body
PF: predicated region fallthrough
CT: control target
= control target key end

     0   :  { %11 = vsyncpa [#allocation3], 0  ;;  %s1586_s0 = inlined_call_operand.hbm [shape: f32[20,128], index: 0, kind: input, shape index: {}]   ;;  %s1587_s1 = inlined_call_operand.hbm [shape: f32[20,128], index: 1, kind: input, shape index: {}]   ;;  %s1588_s2 = inlined_call_operand.hbm [shape: f32[256,128], index: 2, kind: input, shape index: {}]   ;;  %s1589_s3 = inlined_call_operand.vmem [shape: f32[1,128], index: 3, kind: input, shape index: {}]   ;;  %s1590_s4 = inlined_call_operand.hbm [shape: f32[128,128], index: 4, kind: input, shape index: {}]   ;;  %s1591_s5 = inlined_call_operand.vmem [shape: f32[1,128], index: 5, kind: input, shape index: {}]   ;;  %s1592_s6 = inlined_call_operand.hbm [shape: f32[20,128], index: 6, kind: output, shape index: {}]  }
   0x1   :  { %13 = vsyncpa [#allocation3 + $0x1], 0 }
   0x2   :  { %14 = vsyncpa [#allocation6], 0 }
   0x3   :  { %16 = vsyncpa [#allocation6 + $0x1], 0 }
   0x4   :  { %17 = vsyncpa [#allocation9], 0 }
   0x5   :  { %18 = vsyncpa [#allocation4], 0 }
   0x6   :  { %20 = vsyncpa [#allocation4 + $0x1], 0  ;;  %s1250_s21 = smov 0   ;;  %s1252_s22 = smov 0  }
   0x7   :  { %s1254_s23 = smov 0   ;;  %s1256_s24 = smov 0  }
   0x8 LB: > { %s1271_s25 = sadd.s32 4294967295, %s1200_s24   ;;  %s737_s26 = sadd.s32 4294967294, %s1200_s24   ;;  %s1200_s24 = sphi %s1256_s24, %s1616_s24   ;;  %s1196_s23 = sphi %s1254_s23, %s1620_s23   ;;  %s1192_s22 = sphi %s1252_s22, %s1619_s22   ;;  %s1188_s21 = sphi %s1250_s21, %s1618_s21  }
   0x9   : > { %s1275_s27 = sadd.s32 1, %s1200_s24   ;;  %s33_s28 = sadd.s32 1, %s1196_s23 }
   0xa   : > { %1598 = sst [smem:[#allocation16_spill]] %s1275_s27  ;;  %s30_s29 = ssub.s32 %s1200_s24, %s1275_s27 }
   0xb   : > { %p40_p0 = scmp.ne.s32.totalorder %s1196_s23, %s1192_s22  ;;  %p31_p1 = scmp.eq.s32.totalorder %s30_s29, 0 }
   0xc   : > { %p41_p2 = scmp.eq.s32.totalorder %s1200_s24, 0  ;;  %p46_p3 = scmp.ne.s32.totalorder %s1192_s22, %s1188_s21 }
   0xd   : > { %p1593_p4 = scmp.eq.s32.totalorder %s1271_s25, 0  ;;  %p180_p7 = scmp.eq.s32.totalorder %s1271_s25, 1 }
   0xe   : > { %s1287_s30 = scalar_select %p31_p1, %s1196_s23, %s33_s28  }
   0xf   : > { %p1289_p5 = por %p41_p2, %p40_p0  ;;  %p1295_p6 = por %p1593_p4, %p46_p3 }
  0x10   : > { %1599 = sst [smem:[#allocation17_spill]] %s1287_s30  ;;  %p186_p8 = scmp.eq.s32.totalorder %s737_s26, 1 }
  0x11   : > { %s1600_s7 = scalar_select %p1289_p5, 1, 0 }
  0x12   : > { %s1601_s8 = scalar_select %p1295_p6, 1, 0 }
  0x13   : > { %p738_p9 = scmp.ge.s32.totalorder %s1200_s24, 1  ;;  %p193_p10 = scmp.lt.s32.totalorder %s1200_s24, 3 }
  0x14   : > { %p1302_p11 = por %p180_p7, %p40_p0  ;;  %p1306_p12 = por %p186_p8, %p46_p3 }
  0x15   : > { %p1310_p13 = pnand %p738_p9, %p193_p10  ;;  %s1202_s12 = smov [#allocation7]  }
  0x16   : > { %s1602_s9 = scalar_select %p1302_p11, 1, 0 }
  0x17   : > { %s1603_s10 = scalar_select %p1306_p12, 1, 0 }
  0x18   : > { %s1604_s11 = scalar_select %p1310_p13, 1, 0 }
  0x19   : > { %p944_p1 = pneg %p1310_p13  ;;  %s205_s13 = sshll.u32 %s1202_s12, 4  ;;  %s206_s13 = int_to_ptr.vmem [resolvable:$true] %s205_s13 }
  0x1a   : > { %s1203_s15 = smov [#allocation8]   ;;  %s1010_s19 = scalar_lea.hbm %s1588_s2, 4096 }
  0x1b   : > { %p1318_p2 = pnand %p944_p1, %p1593_p4  ;;  %s221_s16 = sshll.u32 %s1203_s15, 4  ;;  %s1322_s16 = int_to_ptr.vmem [resolvable:$true] %s221_s16 }
  0x1c   : > { %p1011_p0 = scmp.ne.s32.totalorder %s1588_s2, %s1010_s19  ;;  %p1017_p9 = scmp.lt.u32.totalorder %s1010_s19, %s1588_s2 }
  0x1d   : > { %p1012_p3 = pneg %p1318_p2 }
  0x1f   : > { %p1013_p7 = pnand %p1012_p3, %p1011_p0 }
  0x21   : > { %p1014_p8 = pneg %p1013_p7 }
  0x23   : > { %p1019_p10 = pnand %p1017_p9, %p1014_p8 }
  0x25   : > { %1022 = shalt.err (!%p1019_p10)
}
  0x26   : > { %s1023_s12 = scalar_lea.vmem %s206_s13, 4096  ;;  %p1031_p11 = scmp.lt.s32.totalorder %s206_s13, %s206_s13 }
  0x27   : > { %p1024_p1 = scmp.ne.s32.totalorder %s206_s13, %s1023_s12  ;;  %p1032_p6 = scmp.lt.s32.totalorder %s1023_s12, %s1023_s12 }
  0x29   : > { %p1026_p4 = pnand %p1024_p1, %p1012_p3  ;;  %p1033_p13 = por %p1032_p6, %p1031_p11 }
  0x2b   : > { %p1027_p12 = pneg %p1026_p4 }
  0x2d   : > { %p1034_p5 = pnand %p1033_p13, %p1027_p12 }
  0x2f   : > { %1037 = shalt.err (!%p1034_p5)
}
  0x30   : > { %s1204_s15 = smov 128   ;;  %s1205_s17 = smov 8  }
  0x31   : > { %947 = dma.hbm_to_vmem [thread:$0]  (!%p1318_p2), %s1588_s2, 4096, %s206_s13, [#allocation6], %s1204_s15, %s1204_s15, %s1205_s17  }
  0x32   : > { %s1038_s28 = scalar_lea.hbm %s1590_s4, 2048 }
  0x33   : > { %p1039_p4 = scmp.ne.s32.totalorder %s1590_s4, %s1038_s28  ;;  %p1045_p11 = scmp.lt.u32.totalorder %s1038_s28, %s1590_s4 }
  0x35   : > { %p1041_p5 = pnand %p1039_p4, %p1012_p3 }
  0x37   : > { %p1042_p6 = pneg %p1041_p5 }
  0x39   : > { %p1047_p12 = pnand %p1045_p11, %p1042_p6 }
  0x3b   : > { %1050 = shalt.err (!%p1047_p12)
}
  0x3c   : > { %s1051_s13 = scalar_lea.vmem %s1322_s16, 2048  ;;  %p1059_p8 = scmp.lt.s32.totalorder %s1322_s16, %s1322_s16 }
  0x3d   : > { %p1052_p13 = scmp.ne.s32.totalorder %s1322_s16, %s1051_s13  ;;  %p1060_p9 = scmp.lt.s32.totalorder %s1051_s13, %s1051_s13 }
  0x3f   : > { %p1054_p0 = pnand %p1052_p13, %p1012_p3  ;;  %p1061_p10 = por %p1060_p9, %p1059_p8 }
  0x41   : > { %p1055_p7 = pneg %p1054_p0 }
  0x43   : > { %p1062_p1 = pnand %p1061_p10, %p1055_p7 }
  0x45   : > { %1065 = shalt.err (!%p1062_p1)
}
  0x46   : > { %950 = dma.hbm_to_vmem [thread:$0]  (!%p1318_p2), %s1590_s4, 2048, %s1322_s16, [#allocation9], %s1204_s15, %s1204_s15, %s1205_s17  }
  0x47   : > { %p741_p4 = scmp.ge.s32.totalorder %s1200_s24, 2 }
  0x48   : > { %p1606_p3 = scmp.ne.s32.totalorder (!%p741_p4), %s1600_s7, 0 }
  0x49   : > { %234 = sbr.rel (%p741_p4) target bundleno = 152 (0x98), region = 32 }
  0x50   : > { %237 = sbr.rel (!%p1606_p3) target bundleno = 115 (0x73), region = 36  ;;  %s238_s18 = sand.u32 (%p1606_p3), 1, %s1196_s23  }
  0x51   : > { %s743_s19 = sshll.u32 (%p1606_p3), %s1200_s24, 1  ;;  %s742_s20 = sshll.u32 (%p1606_p3), %s238_s18, 4 }
  0x52   : > { %s244_s26 = ssub.s32 (%p1606_p3), 3, %s743_s19  ;;  %s1381_s15 = scalar_lea.sflag (%p1606_p3), [#allocation3], %s238_s18 }
  0x53   : > { %p245_p5 = scmp.lt.s32.totalorder (%p1606_p3), %s244_s26, 2  ;;  %s242_s17 = scalar_lea.vmem (%p1606_p3), [#allocation2], %s742_s20 }
  0x57   : > { %s1622_s26 = smov (!%p245_p5, %s244_s26), 2 }
  0x58   : > { %s1378_s14 = sshll.u32 %s1622_s26, 7 }
  0x59   : > { %s249_s16 = ssub.s32 256, %s1378_s14 }
  0x5a   : > { %250 = vsyncadd %s1381_s15, %s249_s16  ;;  %p745_p2 = scmp.ne.s32.totalorder %s1378_s14, 0  ;;  %s775_s28 = sshll.u32 %s1200_s24, 8 }
  0x5b   : > { %s1389_s13 = scalar_lea.hbm %s1586_s0, %s775_s28  ;;  %s255_s27 = sshll.u32 %s242_s17, 4  ;;  %s1391_s27 = int_to_ptr.vmem [resolvable:$true] %s255_s27 }
  0x5c   : > { %s1066_s30 = scalar_lea.hbm %s1389_s13, %s1378_s14  ;;  %s1070_s20 = scalar_lea.hbm %s1586_s0, 384 }
  0x5d   : > { %p1067_p6 = scmp.ne.s32.totalorder %s1389_s13, %s1066_s30  ;;  %p1071_p13 = scmp.lt.u32.totalorder %s1389_s13, %s1586_s0 }
  0x5e   : > { %p1072_p0 = scmp.lt.u32.totalorder %s1070_s20, %s1066_s30  ;;  %p1074_p8 = scmp.lt.u32.totalorder %s1066_s30, %s1389_s13 }
  0x5f   : > { %p1068_p11 = pnand %p1067_p6, %p745_p2 }
  0x60   : > { %p1073_p7 = por %p1072_p0, %p1071_p13 }
  0x61   : > { %p1069_p12 = pneg %p1068_p11 }
  0x62   : > { %p1075_p9 = por %p1074_p8, %p1073_p7 }
  0x64   : > { %p1076_p10 = pnand %p1075_p9, %p1069_p12 }
  0x66   : > { %1079 = shalt.err (!%p1076_p10)
}
  0x67   : > { %s1080_s17 = scalar_lea.vmem %s1391_s27, %s1378_s14  ;;  %s1206_s28 = smov [#allocation2]  }
  0x68   : > { %p1081_p1 = scmp.ne.s32.totalorder %s1391_s27, %s1080_s17  ;;  %s1084_s29 = sshll.u32 %s1206_s28, 4  ;;  %s1085_s29 = int_to_ptr.vmem [resolvable:$false] %s1084_s29 }
  0x69   : > { %s1086_s12 = scalar_lea.vmem %s1085_s29, 512  ;;  %p1087_p6 = scmp.lt.s32.totalorder %s1391_s27, %s1085_s29 }
  0x6a   : > { %p1082_p3 = pnand %p1081_p1, %p745_p2  ;;  %p1088_p11 = scmp.lt.s32.totalorder %s1086_s12, %s1080_s17 }
  0x6c   : > { %p1083_p5 = pneg %p1082_p3  ;;  %p1089_p13 = por %p1088_p11, %p1087_p6 }
  0x6e   : > { %p1090_p0 = pnand %p1089_p13, %p1083_p5 }
  0x70   : > { %1093 = shalt.err (!%p1090_p0)
}
  0x71   : > { %s1207_s30 = smov 128   ;;  %s1208_s18 = smov 8  }
  0x72   : > { %261 = dma.hbm_to_vmem [thread:$0]  (%p745_p2), %s1389_s13, %s1378_s14, %s1391_s27, %s1381_s15, %s1207_s30, %s1207_s30, %s1208_s18  }
  0x73 PF: > { %p1607_p12 = scmp.ne.s32.totalorder %s1600_s7, 0 }
  0x74   : > { %s265_s19 = sand.u32 (%p1607_p12), 1, %s1200_s24   ;;  %s267_s20 = sand.u32 (%p1607_p12), 1, %s1196_s23  }
  0x75   : > { %264 = sbr.rel (!%p1607_p12) target bundleno = 152 (0x98), region = 40  ;;  %s749_s26 = sshll.u32 (%p1607_p12), %s267_s20, 4 }
  0x76   : > { %s750_s16 = sshll.u32 (%p1607_p12), %s1200_s24, 1  ;;  %s1426_s12 = scalar_lea.sflag (%p1607_p12), [#allocation6], %s265_s19 }
  0x77   : > { %s271_s17 = ssub.s32 (%p1607_p12), 3, %s750_s16  ;;  %s269_s14 = scalar_lea.vmem (%p1607_p12), [#allocation5], %s749_s26 }
  0x78   : > { %p272_p7 = scmp.lt.s32.totalorder (%p1607_p12), %s271_s17, 2 }
  0x7c   : > { %s1624_s17 = smov (!%p272_p7, %s271_s17), 2 }
  0x7d   : > { %s1423_s28 = sshll.u32 %s1624_s17, 7 }
  0x7e   : > { %s276_s29 = ssub.s32 256, %s1423_s28 }
  0x7f   : > { %277 = vsyncadd %s1426_s12, %s276_s29  ;;  %p752_p2 = scmp.ne.s32.totalorder %s1423_s28, 0  ;;  %s776_s7 = sshll.u32 %s1200_s24, 8 }
  0x80   : > { %s1434_s27 = scalar_lea.hbm %s1587_s1, %s776_s7  ;;  %s282_s30 = sshll.u32 %s269_s14, 4  ;;  %s1436_s30 = int_to_ptr.vmem [resolvable:$true] %s282_s30 }
  0x81   : > { %s1094_s18 = scalar_lea.hbm %s1434_s27, %s1423_s28  ;;  %s1098_s26 = scalar_lea.hbm %s1587_s1, 384 }
  0x82   : > { %p1095_p8 = scmp.ne.s32.totalorder %s1434_s27, %s1094_s18  ;;  %p1099_p1 = scmp.lt.u32.totalorder %s1434_s27, %s1587_s1 }
  0x83   : > { %p1100_p3 = scmp.lt.u32.totalorder %s1098_s26, %s1094_s18  ;;  %p1102_p6 = scmp.lt.u32.totalorder %s1094_s18, %s1434_s27 }
  0x84   : > { %p1096_p9 = pnand %p1095_p8, %p752_p2 }
  0x85   : > { %p1101_p5 = por %p1100_p3, %p1099_p1 }
  0x86   : > { %p1097_p10 = pneg %p1096_p9 }
  0x87   : > { %p1103_p11 = por %p1102_p6, %p1101_p5 }
  0x89   : > { %p1104_p13 = pnand %p1103_p11, %p1097_p10 }
  0x8b   : > { %1107 = shalt.err (!%p1104_p13)
}
  0x8c   : > { %s1108_s29 = scalar_lea.vmem %s1436_s30, %s1423_s28  ;;  %s1209_s14 = smov [#allocation5]  }
  0x8d   : > { %p1109_p0 = scmp.ne.s32.totalorder %s1436_s30, %s1108_s29  ;;  %s1112_s7 = sshll.u32 %s1209_s14, 4  ;;  %s1113_s7 = int_to_ptr.vmem [resolvable:$false] %s1112_s7 }
  0x8e   : > { %s1114_s15 = scalar_lea.vmem %s1113_s7, 512  ;;  %p1115_p8 = scmp.lt.s32.totalorder %s1436_s30, %s1113_s7 }
  0x8f   : > { %p1110_p12 = pnand %p1109_p0, %p752_p2  ;;  %p1116_p9 = scmp.lt.s32.totalorder %s1114_s15, %s1108_s29 }
  0x91   : > { %p1111_p7 = pneg %p1110_p12  ;;  %p1117_p1 = por %p1116_p9, %p1115_p8 }
  0x93   : > { %p1118_p3 = pnand %p1117_p1, %p1111_p7 }
  0x95   : > { %1121 = shalt.err (!%p1118_p3)
}
  0x96   : > { %s1210_s13 = smov 128   ;;  %s1211_s18 = smov 8  }
  0x97   : > { %288 = dma.hbm_to_vmem [thread:$0]  (%p752_p2), %s1434_s27, %s1423_s28, %s1436_s30, %s1426_s12, %s1210_s13, %s1210_s13, %s1211_s18  }
  0x98 PF: > { %p1608_p10 = scmp.ne.s32.totalorder %s1604_s11, 0 }
  0x99   : > { %s1466_s19 = sand.u32 (!%p1608_p10), 1, %s1192_s22   ;;  %p1609_p5 = scmp.ne.s32.totalorder (!%p1608_p10), %s1601_s8, 0 }
  0x9a   : > { %294 = sbr.rel (%p1608_p10) target bundleno = 701 (0x2bd), region = 44  ;;  %s1469_s20 = sshll.u32 (!%p1608_p10), %s1466_s19, 4 }
  0x9b   : > { %s297_s26 = scalar_lea.sflag (!%p1608_p10), [#allocation3], %s1466_s19  ;;  %s300_s16 = scalar_lea.vmem (!%p1608_p10), [#allocation2], %s1469_s20 }
  0xa1   : > { %1167 = dma.done.wait (%p1609_p5), %s297_s26, 256  }
  0xa2   : > { %1169 = vsyncadd (%p1609_p5), %s297_s26, 4294967040  ;;  %s305_s11 = sand.u32 1, %s1271_s25   ;;  %s309_s12 = scalar_lea.vmem [#allocation5], %s1469_s20 }
  0xa3   : > { %s306_s28 = scalar_lea.sflag [#allocation6], %s305_s11 }
  0xa4   : > { %1171 = dma.done.wait (%p1609_p5), %s306_s28, 256  }
  0xa5   : > { %1173 = vsyncadd (%p1609_p5), %s306_s28, 4294967040  ;;  %p1610_p2 = scmp.eq.s32.totalorder %s1271_s25, 0 }
  0xa7   : > { %1175 = dma.done.wait (%p1610_p2), [#allocation6], 4096   ;;  %p1611_p6 = pmov %p1610_p2 }
  0xa8   : > { %p1612_p11 = pmov %p1610_p2 }
  0xa9   : > { %1177 = vsyncadd (%p1611_p6), [#allocation6], 4294963200 }
  0xaa   : > { %1179 = dma.done.wait (%p1612_p11), [#allocation9], 2048   ;;  %p1613_p13 = pmov %p1610_p2 }
  0xab   : > { %v386_v0 = vld [vmem:[#allocation7 + $0x80] sm:$0xff]  ;;  %v387_v1 = vld [vmem:[#allocation7 + $0x88] sm:$0xff]  ;;  %v388_v5 = vld [vmem:[#allocation7 + $0x90] sm:$0xff]  ;;  %s350_s29 = scalar_lea.vmem [#allocation10], %s1469_s20  ;;  %s603_s14 = scalar_lea.sflag [#allocation4], %s1466_s19 }
  0xac   : > { %1181 = vsyncadd (%p1613_p13), [#allocation9], 4294965248  ;;  %v370_v2 = vld [vmem:[#allocation7] sm:$0xff]  ;;  %v869_v3 = vpack.c.bf16 %v387_v1, %v386_v0  ;;  %v371_v4 = vld [vmem:[#allocation7 + $0x8] sm:$0xff]  ;;  %p1614_p0 = scmp.ne.s32.totalorder %s1602_s9, 0 }
  0xad   : > { %v389_v6 = vld [vmem:[#allocation7 + $0x98] sm:$0xff]  ;;  %v871_v7 = vpack.c.bf16 %v371_v4, %v370_v2  ;;  %v372_v9 = vld [vmem:[#allocation7 + $0x10] sm:$0xff]  ;;  %v390_v11 = vld [vmem:[#allocation7 + $0xa0] sm:$0xff]  ;;  %s767_s7 = sshll.u32 (%p1614_p0), %s1271_s25, 1 }
  0xae   : > { %v873_v8 = vpack.c.bf16 %v389_v6, %v388_v5  ;;  %v373_v10 = vld [vmem:[#allocation7 + $0x18] sm:$0xff]  ;;  %870 = vmatprep.subr.bf16.mxu0 %v869_v3  ;;  %v391_v12 = vld [vmem:[#allocation7 + $0xa8] sm:$0xff]  ;;  %v374_v15 = vld [vmem:[#allocation7 + $0x20] sm:$0xff]  ;;  %s611_s15 = ssub.s32 (%p1614_p0), 3, %s767_s7 }
  0xaf   : > { %872 = vmatpush3.bf16.msra.mxu0 %v871_v7  ;;  %v875_v13 = vpack.c.bf16 %v373_v10, %v372_v9  ;;  %v877_v14 = vpack.c.bf16 %v391_v12, %v390_v11  ;;  %v375_v16 = vld [vmem:[#allocation7 + $0x28] sm:$0xff]  ;;  %v392_v17 = vld [vmem:[#allocation7 + $0xb0] sm:$0xff]  ;;  %v393_v18 = vld [vmem:[#allocation7 + $0xb8] sm:$0xff]  ;;  %p612_p12 = scmp.lt.s32.totalorder (%p1614_p0), %s611_s15, 2 }
  0xb0   : > { %874 = vmatprep.subr.bf16.mxu0 %v873_v8  ;;  %v879_v19 = vpack.c.bf16 %v375_v16, %v374_v15  ;;  %v881_v20 = vpack.c.bf16 %v393_v18, %v392_v17  ;;  %v376_v21 = vld [vmem:[#allocation7 + $0x30] sm:$0xff]  ;;  %v377_v22 = vld [vmem:[#allocation7 + $0x38] sm:$0xff]  ;;  %v394_v23 = vld [vmem:[#allocation7 + $0xc0] sm:$0xff] }
  0xb1   : > { %v395_v24 = vld [vmem:[#allocation7 + $0xc8] sm:$0xff]  ;;  %v1493_v25 = vld [vmem:[%s309_s12] sm:$0xff]  ;;  %v883_v26 = vpack.c.bf16 %v377_v22, %v376_v21  ;;  %v397_v31 = vld [vmem:[#allocation7 + $0xd8] sm:$0xff] }
  0xb2   : > { %473 = vmatprep.mubr.f32.mxu0 %v1493_v25  ;;  %v885_v27 = vpack.c.bf16 %v395_v24, %v394_v23  ;;  %v378_v28 = vld [vmem:[#allocation7 + $0x40] sm:$0xff]  ;;  %v379_v29 = vld [vmem:[#allocation7 + $0x48] sm:$0xff]  ;;  %v396_v30 = vld [vmem:[#allocation7 + $0xd0] sm:$0xff] }
  0xb3   : > { %876 = vmatpush3.bf16.msra.mxu0 %v875_v13  ;;  %v887_v32 = vpack.c.bf16 %v379_v29, %v378_v28  ;;  %v889_v33 = vpack.c.bf16 %v397_v31, %v396_v30  ;;  %v380_v34 = vld [vmem:[#allocation7 + $0x50] sm:$0xff]  ;;  %v381_v35 = vld [vmem:[#allocation7 + $0x58] sm:$0xff]  ;;  %v398_v36 = vld [vmem:[#allocation7 + $0xe0] sm:$0xff] }
  0xb4   : > { %878 = vmatprep.subr.bf16.mxu0 %v877_v14  ;;  %v399_v37 = vld [vmem:[#allocation7 + $0xe8] sm:$0xff]  ;;  %v891_v38 = vpack.c.bf16 %v381_v35, %v380_v34  ;;  %v382_v40 = vld [vmem:[#allocation7 + $0x60] sm:$0xff]  ;;  %v400_v42 = vld [vmem:[#allocation7 + $0xf0] sm:$0xff] }
  0xb5   : > { %v893_v39 = vpack.c.bf16 %v399_v37, %v398_v36  ;;  %v383_v41 = vld [vmem:[#allocation7 + $0x68] sm:$0xff]  ;;  %v401_v43 = vld [vmem:[#allocation7 + $0xf8] sm:$0xff]  ;;  %v384_v46 = vld [vmem:[#allocation7 + $0x70] sm:$0xff] }
  0xb6   : > { %v895_v44 = vpack.c.bf16 %v383_v41, %v382_v40  ;;  %v897_v45 = vpack.c.bf16 %v401_v43, %v400_v42  ;;  %v385_v47 = vld [vmem:[#allocation7 + $0x78] sm:$0xff]  ;;  %v1498_v49 = vld [vmem:[%s300_s16] sm:$0xff]  ;;  %v503_v53 = vld [vmem:[#allocation8 + $0x8] sm:$0xff] }
  0xb7   : > { %880 = vmatpush3.bf16.msra.mxu0 %v879_v19  ;;  %v899_v48 = vpack.c.bf16 %v385_v47, %v384_v46  ;;  %v1502_v50 = vld [vmem:[%s309_s12 + $0x8] sm:$0xff]  ;;  %v502_v52 = vld [vmem:[#allocation8] sm:$0xff]  ;;  %v504_v55 = vld [vmem:[#allocation8 + $0x10] sm:$0xff]  ;;  %v496_v28 = vsub.f32 %v1498_v49, %v1493_v25 }
  0xb8   : > { %882 = vmatprep.subr.bf16.mxu0 %v881_v20  ;;  %v1508_v51 = vld [vmem:[%s300_s16 + $0x8] sm:$0xff]  ;;  %v901_v54 = vpack.c.bf16 %v503_v53, %v502_v52  ;;  %v506_v58 = vld [vmem:[#allocation8 + $0x20] sm:$0xff]  ;;  %v508_v61 = vld [vmem:[#allocation8 + $0x30] sm:$0xff] }
  0xb9   : > { %v505_v56 = vld [vmem:[#allocation8 + $0x18] sm:$0xff]  ;;  %v507_v59 = vld [vmem:[#allocation8 + $0x28] sm:$0xff]  ;;  %v510_v0 = vld [vmem:[#allocation8 + $0x40] sm:$0xff]  ;;  %v497_v30 = vsub.f32 %v1508_v51, %v1502_v50 }
  0xba   : > { %902 = vmatprep.subr.bf16.mxu1 %v901_v54  ;;  %v905_v57 = vpack.c.bf16 %v505_v56, %v504_v55  ;;  %v909_v60 = vpack.c.bf16 %v507_v59, %v506_v58  ;;  %v509_v62 = vld [vmem:[#allocation8 + $0x38] sm:$0xff]  ;;  %v511_v1 = vld [vmem:[#allocation8 + $0x48] sm:$0xff]  ;;  %v512_v3 = vld [vmem:[#allocation8 + $0x50] sm:$0xff] }
  0xbb   : > { %884 = vmatpush3.bf16.msra.mxu0 %v883_v26  ;;  %904 = vmatpush3.bf16.msra.mxu1 %v901_v54  ;;  %v913_v63 = vpack.c.bf16 %v509_v62, %v508_v61  ;;  %v917_v2 = vpack.c.bf16 %v511_v1, %v510_v0  ;;  %v513_v4 = vld [vmem:[#allocation8 + $0x58] sm:$0xff]  ;;  %v514_v5 = vld [vmem:[#allocation8 + $0x60] sm:$0xff]  ;;  %v515_v7 = vld [vmem:[#allocation8 + $0x68] sm:$0xff] }
  0xbc   : > { %886 = vmatprep.subr.bf16.mxu0 %v885_v27  ;;  %906 = vmatprep.subr.bf16.mxu1 %v905_v57  ;;  %v921_v6 = vpack.c.bf16 %v513_v4, %v512_v3  ;;  %v925_v8 = vpack.c.bf16 %v515_v7, %v514_v5  ;;  %v516_v9 = vld [vmem:[#allocation8 + $0x70] sm:$0xff]  ;;  %v517_v10 = vld [vmem:[#allocation8 + $0x78] sm:$0xff]  ;;  %v762_v13 = vld [vmem:[%s1589_s3] ss:$0 sm:$0xff] }
  0xbd   : > { %v929_v11 = vpack.c.bf16 %v517_v10, %v516_v9  ;;  %v765_v36 = vld [vmem:[%s1591_s5] ss:$0 sm:$0xff] }
  0xbf   : > { %888 = vmatpush3.bf16.msra.mxu0 %v887_v32  ;;  %908 = vmatpush3.bf16.msra.mxu1 %v905_v57 }
  0xc0   : > { %890 = vmatprep.subr.bf16.mxu0 %v889_v33  ;;  %910 = vmatprep.subr.bf16.mxu1 %v909_v60 }
  0xc3   : > { %892 = vmatpush3.bf16.msra.mxu0 %v891_v38  ;;  %912 = vmatpush3.bf16.msra.mxu1 %v909_v60 }
  0xc4   : > { %894 = vmatprep.subr.bf16.mxu0 %v893_v39  ;;  %914 = vmatprep.subr.bf16.mxu1 %v913_v63 }
  0xc7   : > { %896 = vmatpush3.bf16.msra.mxu0 %v895_v44  ;;  %916 = vmatpush3.bf16.msra.mxu1 %v913_v63 }
  0xc8   : > { %898 = vmatprep.subr.bf16.mxu0 %v897_v45  ;;  %918 = vmatprep.subr.bf16.mxu1 %v917_v2 }
  0xcb   : > { %900 = vmatpush3.bf16.msra.mxu0 %v899_v48  ;;  %920 = vmatpush3.bf16.msra.mxu1 %v917_v2 }
  0xcc   : > { %922 = vmatprep.subr.bf16.mxu1 %v921_v6 }
  0xce   : > { %474 = vmatmul.mubr.f32.vlgmr.msra.gmra.mrb[0].mxu0 %v1498_v49 }
  0xcf   : > { %478 = vmatprep.mubr.f32.mxu0 %v1502_v50  ;;  %924 = vmatpush3.bf16.msra.mxu1 %v921_v6 }
  0xd0   : > { %926 = vmatprep.subr.bf16.mxu1 %v925_v8 }
  0xd2   : > { %479 = vmatmul.mubr.f32.gmra.mrb[2].mxu0 %v1508_v51 }
  0xd3   : > { %928 = vmatpush3.bf16.msra.mxu1 %v925_v8 }
  0xd4   : > { %930 = vmatprep.subr.bf16.mxu1 %v929_v11 }
  0xd7   : > { %932 = vmatpush3.bf16.msra.mxu1 %v929_v11 }
 0x1a1   : > { %v810_v12 = vpop.f32.mrb[0].mxu0 }
 0x1a2   : > { %v811_v14 = vpop.f32.mrb[1].mxu0 }
 0x1a3   : > { %v812_v15 = vadd.f32 %v811_v14, %v810_v12 }
 0x1a5   : > { %v476_v16 = vadd.f32 %v812_v15, %v762_v13  ;;  %v813_v17 = vpop.f32.mrb[2].mxu0 }
 0x1a6   : > { %v814_v18 = vpop.f32.mrb[3].mxu0 }
 0x1a7   : > { %v763_v19 = vmul.f32 -1.442695, %v476_v16  ;;  %v815_v20 = vadd.f32 %v814_v18, %v813_v17 }
 0x1a9   : > { %1002 = vpow2.f32 %v763_v19  ;;  %v481_v21 = vadd.f32 %v815_v20, %v762_v13 }
 0x1ab   : > { %v764_v22 = vmul.f32 -1.442695, %v481_v21 }
 0x1ad   : > { %1004 = vpow2.f32 %v764_v22 }
 0x1b3   : > { %v1003_v23 = vpop.eup %1002 }
 0x1b4   : > { %v490_v24 = vadd.f32 1.0, %v1003_v23 }
 0x1b6   : > { %1006 = vrcp.f32 %v490_v24 }
 0x1b7   : > { %v1005_v26 = vpop.eup %1004 }
 0x1b8   : > { %v491_v27 = vadd.f32 1.0, %v1005_v26 }
 0x1ba   : > { %1008 = vrcp.f32 %v491_v27 }
 0x1c0   : > { %v1007_v29 = vpop.eup %1006 }
 0x1c1   : > { %v498_v31 = vmul.f32 %v1007_v29, %v496_v28 }
 0x1c3   : > { %v500_v32 = vadd.f32 %v498_v31, %v1493_v25 }
 0x1c4   : > { %v1009_v33 = vpop.eup %1008 }
 0x1c5   : > { %866 = vmatprep.mubr.f32.mxu1 %v500_v32  ;;  %v499_v34 = vmul.f32 %v1009_v33, %v497_v30 }
 0x1c7   : > { %v501_v35 = vadd.f32 %v499_v34, %v1502_v50 }
 0x1c9   : > { %867 = vmatmul.mubr.f32.vlgmr.msra.gmra.mrb[0].mxu1 %v501_v35 }
 0x29a   : > { %609 = sbr.rel (!%p1614_p0) target bundleno = 701 (0x2bd), region = 64 }
 0x29c   : > { %v868_v37 = vpop.f32.mrb[0].mxu1 }
 0x29d   : > { %v597_v38 = vadd.f32 %v868_v37, %v765_v36  ;;  %v591_v39 = vpop.f32.mrb[1].mxu1 }
 0x29e   : > { %v592_v40 = vadd.f32 %v765_v36, %v591_v39 }
 0x29f   : > { %601 = vst [vmem:[%s350_s29 + $0x8] sm:$0xff] %v597_v38 }
 0x2a0   : > { %600 = vst [vmem:[%s350_s29] sm:$0xff] %v592_v40 }
 0x2a1   : > { %s1626_s15 = smov (!%p612_p12, %s611_s15), 2 }
 0x2a2   : > { %s1528_s13 = sshll.u32 %s1626_s15, 7 }
 0x2a3   : > { %s616_s18 = ssub.s32 256, %s1528_s13 }
 0x2a4   : > { %617 = vsyncadd %s603_s14, %s616_s18  ;;  %p769_p7 = scmp.ne.s32.totalorder %s1528_s13, 0  ;;  %s777_s20 = sshll.u32 %s1271_s25, 8 }
 0x2a5   : > { %s1538_s16 = scalar_lea.hbm %s1592_s6, %s777_s20  ;;  %s622_s11 = sshll.u32 %s350_s29, 4  ;;  %s1540_s11 = int_to_ptr.vmem [resolvable:$true] %s622_s11 }
 0x2a6   : > { %s1122_s28 = scalar_lea.vmem %s1540_s11, %s1528_s13  ;;  %s1212_s12 = smov [#allocation10]  }
 0x2a7   : > { %p1123_p8 = scmp.ne.s32.totalorder %s1540_s11, %s1122_s28  ;;  %s1126_s8 = sshll.u32 %s1212_s12, 4  ;;  %s1127_s8 = int_to_ptr.vmem [resolvable:$false] %s1126_s8 }
 0x2a8   : > { %s1128_s25 = scalar_lea.vmem %s1127_s8, 512  ;;  %p1129_p3 = scmp.lt.s32.totalorder %s1540_s11, %s1127_s8 }
 0x2a9   : > { %p1124_p9 = pnand %p1123_p8, %p769_p7  ;;  %p1130_p10 = scmp.lt.s32.totalorder %s1128_s25, %s1122_s28 }
 0x2ab   : > { %p1125_p1 = pneg %p1124_p9  ;;  %p1131_p5 = por %p1130_p10, %p1129_p3 }
 0x2ad   : > { %p1132_p2 = pnand %p1131_p5, %p1125_p1 }
 0x2af   : > { %1135 = shalt.err (!%p1132_p2)
}
 0x2b0   : > { %s1136_s27 = scalar_lea.hbm %s1538_s16, %s1528_s13  ;;  %s1140_s29 = scalar_lea.hbm %s1592_s6, 384 }
 0x2b1   : > { %p1137_p6 = scmp.ne.s32.totalorder %s1538_s16, %s1136_s27  ;;  %p1141_p0 = scmp.lt.u32.totalorder %s1538_s16, %s1592_s6 }
 0x2b2   : > { %p1142_p12 = scmp.lt.u32.totalorder %s1140_s29, %s1136_s27  ;;  %p1144_p9 = scmp.lt.u32.totalorder %s1136_s27, %s1538_s16 }
 0x2b3   : > { %p1138_p11 = pnand %p1137_p6, %p769_p7 }
 0x2b4   : > { %p1143_p8 = por %p1142_p12, %p1141_p0 }
 0x2b5   : > { %p1139_p13 = pneg %p1138_p11 }
 0x2b6   : > { %p1145_p1 = por %p1144_p9, %p1143_p8 }
 0x2b8   : > { %p1146_p3 = pnand %p1145_p1, %p1139_p13 }
 0x2ba   : > { %1149 = shalt.err (!%p1146_p3)
}
 0x2bb   : > { %s1213_s18 = smov 128   ;;  %s1214_s20 = smov 8  }
 0x2bc   : > { %628 = dma.vmem_to_hbm [thread:$0]  (%p769_p7), %s1540_s11, %s1528_s13, %s1538_s16, %s603_s14, %s1213_s18, %s1213_s18, %s1214_s20  }
 0x2bd PF: > { %s637_s9 = sand.u32 1, %s1188_s21   ;;  %p1615_p10 = scmp.ne.s32.totalorder %s1603_s10, 0 }
 0x2be   : > { %s638_s26 = scalar_lea.sflag [#allocation4], %s637_s9 }
 0x2bf   : > { %p952_p5 = pnand %p741_p4, %p1615_p10 }
 0x2c1   : > { %1183 = dma.done.wait (!%p952_p5), %s638_s26, 256  }
 0x2c2   : > { %1185 = vsyncadd (!%p952_p5), %s638_s26, 4294967040  ;;  %s1616_s24 = sld [smem:[#allocation16_spill]]  ;;  %s1617_s28 = sld [smem:[#allocation17_spill]] }
 0x2c3   : > { %s1618_s21 = smov %s1192_s22  ;;  %s1619_s22 = smov %s1196_s23 }
 0x2c8   : > { %p23_p2 = scmp.ge.s32.totalorder %s1616_s24, 4   ;;  %s1620_s23 = smov %s1617_s28 }
 0x2ca   :  { %25 = sbr.rel (!%p23_p2) target bundleno = 8 (0x8), region = 110 }
 0x2d1   :  { %643 = vsyncpa [#allocation3], 1 }
 0x2d2   :  { %645 = vsyncpa [#allocation3 + $0x1], 1 }
 0x2d3   :  { %646 = vsyncpa [#allocation6], 1 }
 0x2d4   :  { %648 = vsyncpa [#allocation6 + $0x1], 1 }
 0x2d5   :  { %649 = vsyncpa [#allocation9], 1 }
 0x2d6   :  { %650 = vsyncpa [#allocation4], 1 }
 0x2d7   :  { %652 = vsyncpa [#allocation4 + $0x1], 1 }

</bundles_post_ra>
